<compile_context>
chip_gen: v7x
topology: tpu7x:2x2x1
jax: 0.10.0
libtpu: 0.0.40
codegen_flags: <defaults>
</compile_context>

<pallas_src>
import functools

import jax
import jax.numpy as jnp
from jax.experimental import pallas as pl
from jax.experimental.pallas import tpu as pltpu

_TINY_BYTES = 64 * 1024          # below this, kernel launch overhead dominates
_CHUNK_BYTES = 4 * 1024 * 1024   # at/above this, split into concurrent DMAs
_MAX_CHUNKS = 4                  # a handful of in-flight DMAs is plenty


def _leading_dim_chunks(shape, nbytes):
    """Static (start, size) splits along axis 0, or None for one full-ref copy."""
    if not shape or shape[0] < 2 or nbytes < _CHUNK_BYTES:
        return None
    rows = shape[0]
    n = min(_MAX_CHUNKS, rows)
    base, rem = divmod(rows, n)
    chunks, start = [], 0
    for i in range(n):
        size = base + (1 if i < rem else 0)
        chunks.append((start, size))
        start += size
    return chunks


def _dma_identity_kernel(x_hbm, o_hbm, sem, *, chunks):
    # Pure data movement: issue HBM->HBM DMAs, then wait.  Starting every copy
    # before the first wait keeps multiple DMAs in flight.
    # (On v7x the DMA engines/HBM controllers do the work, so a single-core
    # issue point is not a bandwidth bottleneck for this pattern.)
    if chunks is None:
        copies = [pltpu.make_async_copy(x_hbm, o_hbm, sem.at[0])]
    else:
        copies = [
            pltpu.make_async_copy(
                x_hbm.at[pl.ds(start, size)],
                o_hbm.at[pl.ds(start, size)],
                sem.at[i],
            )
            for i, (start, size) in enumerate(chunks)
        ]
    for cp in copies:
        cp.start()
    for cp in copies:
        cp.wait()


def _pallas_identity_copy(x):
    nbytes = x.size * jnp.dtype(x.dtype).itemsize
    chunks = _leading_dim_chunks(x.shape, nbytes)
    nsem = 1 if chunks is None else len(chunks)
    return pl.pallas_call(
        functools.partial(_dma_identity_kernel, chunks=chunks),
        out_shape=jax.ShapeDtypeStruct(x.shape, x.dtype),
        in_specs=[pl.BlockSpec(memory_space=pl.ANY)],
        out_specs=pl.BlockSpec(memory_space=pl.ANY),
        scratch_shapes=[pltpu.SemaphoreType.DMA((nsem,))],
    )(x)


def identity(x, donate=False):
    """Identity forward pass: y = x (same shape, same dtype)."""
    if donate:
        # Caller donates the buffer: a true in-place identity is just x itself
        # (zero HBM traffic) -- far better than an aliased copy kernel.
        return x
    n = x.size
    if n == 0:
        return x
    if n * jnp.dtype(x.dtype).itemsize < _TINY_BYTES:
        # Launch + DMA-issue overhead dominates tiny tensors; let XLA copy.
        return jnp.copy(x)
    return _pallas_identity_copy(x)


# adjoint / gramian / beforehand of Identity are identity as well.
adjoint = identity
gramian = identity
beforehand = identity


if __name__ == "__main__":
    key = jax.random.PRNGKey(0)

    # Small, module-consistent input (tiny path: plain XLA copy).
    x = jax.random.normal(key, (2, 4, 16, 16), dtype=jnp.float32)
    y = identity(x)
    jax.block_until_ready(y)
    assert y.shape == x.shape and y.dtype == x.dtype
    assert bool(jnp.all(y == x)), "identity output mismatch (tiny path)"

    # Large enough for the single-DMA Pallas path (~768 KiB).
    a = jax.random.normal(jax.random.PRNGKey(0), (512, 384), dtype=jnp.float32)
    ya = identity(a)
    jax.block_until_ready(ya)
    assert ya.shape == a.shape and ya.dtype == a.dtype
    assert bool(jnp.all(ya == a)), "identity output mismatch (single-DMA path)"

    # Large enough for the chunked multi-DMA path (4 MiB -> 4 concurrent DMAs).
    b = jax.random.normal(jax.random.PRNGKey(1), (1024, 1024), dtype=jnp.float32)
    yb = identity(b)
    jax.block_until_ready(yb)
    assert bool(jnp.all(yb == b)), "identity output mismatch (chunked-DMA path)"

    # Ragged element count (not a multiple of 128), bf16, through the DMA path
    # with no pad/slice round trip.
    c = jax.random.normal(jax.random.PRNGKey(2), (301, 131), dtype=jnp.bfloat16)
    yc = identity(c)
    jax.block_until_ready(yc)
    assert yc.shape == c.shape and yc.dtype == c.dtype
    assert bool(jnp.all(yc == c)), "identity output mismatch (ragged path)"

    # donate=True is a true zero-traffic in-place identity.
    yd = identity(x, donate=True)
    assert yd is x, "donate=True should return the input buffer itself"

    # adjoint / gramian / beforehand are identity too.
    assert bool(jnp.all(adjoint(x) == x))
    assert bool(jnp.all(gramian(x) == x))
    assert bool(jnp.all(beforehand(x) == x))

    print("KERNEL_OK")
</pallas_src>

<mosaic_0001>
module attributes {stable_mosaic.version = 11 : i64} {
  func.func @_dma_identity_kernel(%arg0: memref<512x384xf32, #tpu.memory_space<any>>, %arg1: memref<512x384xf32, #tpu.memory_space<any>>, %arg2: memref<1x!tpu.dma_semaphore, #tpu.memory_space<semaphore_mem>>) attributes {dimension_semantics = [], scalar_prefetch = 0 : i64, scratch_operands = 1 : i64, tpu.core_type = #tpu.core_type<tc>} {
    %c0_i32 = arith.constant 0 : i32
    %0 = tpu.memref_slice %arg2[%c0_i32] : memref<1x!tpu.dma_semaphore, #tpu.memory_space<semaphore_mem>> -> memref<1x!tpu.dma_semaphore, #tpu.memory_space<semaphore_mem>>
    %1 = tpu.memref_squeeze %0 : memref<1x!tpu.dma_semaphore, #tpu.memory_space<semaphore_mem>> -> memref<!tpu.dma_semaphore, #tpu.memory_space<semaphore_mem>>
    tpu.enqueue_dma source(%arg0 : memref<512x384xf32, #tpu.memory_space<any>>) target(%arg1 : memref<512x384xf32, #tpu.memory_space<any>>) target_semaphore(%1 : memref<!tpu.dma_semaphore, #tpu.memory_space<semaphore_mem>>)
    %c0_i32_0 = arith.constant 0 : i32
    %2 = tpu.memref_slice %arg2[%c0_i32_0] : memref<1x!tpu.dma_semaphore, #tpu.memory_space<semaphore_mem>> -> memref<1x!tpu.dma_semaphore, #tpu.memory_space<semaphore_mem>>
    %3 = tpu.memref_squeeze %2 : memref<1x!tpu.dma_semaphore, #tpu.memory_space<semaphore_mem>> -> memref<!tpu.dma_semaphore, #tpu.memory_space<semaphore_mem>>
    tpu.wait_dma2 semaphore(%3 : memref<!tpu.dma_semaphore, #tpu.memory_space<semaphore_mem>>) src(%arg0 : memref<512x384xf32, #tpu.memory_space<any>>) dst(%arg1 : memref<512x384xf32, #tpu.memory_space<any>>)
    return
  }
}

</mosaic_0001>

<bundles_post_ra>
// kernel: tpu_custom_call.1
= control target key start
LH: loop header
LB: loop body
LE: loop exit
PB: predicated region body
PF: predicated region fallthrough
CT: control target
= control target key end

     0   :  { %s35_s6 = smov [#allocation2]   ;;  %s36_s7 = smov [#allocation3]   ;;  %s54_s0 = inlined_call_operand.hbm [shape: f32[512,384], index: 0, kind: input, shape index: {}]   ;;  %s55_s1 = inlined_call_operand.hbm [shape: f32[512,384], index: 1, kind: output, shape index: {}]  }
   0x1   :  { %s37_s8 = smov 0  }
   0x2   :  { %18 = dma.general %s54_s0, 24576, %s55_s1, %s35_s6, %s36_s7, [#allocation4], %s37_s8, 0  }
   0x3   :  { %33 = dma.done.wait [#allocation2], 24576 }
   0x4   :  { %34 = vsyncadd [#allocation2], 4294942720 }
   0x5   :  { %23 = vsyncmov [#allocation2] }
   0x8   :  { %s24_s13 = vpop.sfrf %23 }
   0x9   :  { %p29_p0 = scmp.ne.s32.totalorder %s24_s13, 0 }
   0xb   :  { %28 = shalt.err (%p29_p0)  }

</bundles_post_ra>
